<compile_context>
chip_gen: v5e
topology: v5e:2x2
jax: 0.10.0
libtpu: 0.0.40
codegen_flags: <defaults>
</compile_context>

<pallas_src>
import jax
import jax.numpy as jnp
from jax.experimental import pallas as pl
from jax.experimental.pallas import tpu as pltpu


def _round_up(n, m):
    return ((n + m - 1) // m) * m


def critic_kernel(xa_ref, w1_ref, b1_ref, w2_ref, b2_ref, w3_ref, b3_ref, o_ref):
    """One batch tile; activations are (features, batch) so batch is the lane dim.

    fc1: (Hp, K)  @ (K,  tile_b)  -- single fused MXU matmul (concat folded in wrapper)
    fc2: (Hp, Hp) @ (Hp, tile_b)
    fc3: (1,  Hp) @ (Hp, tile_b)  -- result is already a lane-dense (1, tile_b) row
    bf16 MXU inputs with f32 accumulation; bias / ReLU stay in f32.
    """
    h1 = jnp.dot(w1_ref[...], xa_ref[...], preferred_element_type=jnp.float32) + b1_ref[...]
    h1 = jnp.maximum(h1, 0.0)

    h2 = jnp.dot(w2_ref[...], h1.astype(w2_ref.dtype),
                 preferred_element_type=jnp.float32) + b2_ref[...]
    h2 = jnp.maximum(h2, 0.0)

    # TODO(synk): for very large hidden sizes (~>3k) tile fc2 over Hp (reduction axis last)
    # instead of keeping the full (Hp, Hp) weight VMEM-resident.
    out = jnp.dot(w3_ref[...], h2.astype(w3_ref.dtype),
                  preferred_element_type=jnp.float32) + b3_ref[...]
    o_ref[...] = out.astype(o_ref.dtype)


def _choose_tiles(batch, tile_b):
    if tile_b is None:
        # aim for >= 4 grid steps so v7x's two TCs both get work; cap the lane tile at 2048
        tile_b = _round_up(max(1, -(-batch // 4)), 128)
        tile_b = max(128, min(2048, tile_b))
    else:
        tile_b = max(128, _round_up(tile_b, 128))
    b_pad = _round_up(batch, tile_b)
    return tile_b, b_pad


def _vmem_limit_bytes(tile_b, d_xa, hp, compute_dtype):
    cb = jnp.dtype(compute_dtype).itemsize
    weights = cb * (hp * d_xa + hp * hp + hp) + 4 * (2 * hp + 1)   # w1, w2, w3 + b1, b2, b3
    stream = cb * d_xa * tile_b + 4 * tile_b                       # streamed xa tile + out row
    interm = (4 + cb) * hp * tile_b * 2 + 4 * tile_b               # h1/h2 f32 + their bf16 copies
    est = 2 * weights + 2 * stream + interm                        # pipeline double-buffers blocks
    try:
        phys = pltpu.get_tpu_info().vmem_capacity_bytes            # per-generation ceiling
    except Exception:
        phys = 64 * 1024 * 1024                                    # v7x per-TC VMEM (smallest)
    cap = (phys * 3) // 4
    return int(min(max(2 * est, 16 * 1024 * 1024), cap))


def prepare_params(params, *, compute_dtype=jnp.bfloat16, lane=128):
    """One-time (per parameter update) repack: transpose to (out, in), zero-pad the hidden
    dim to a lane multiple, and cast the matmul operands to the MXU dtype.
    Hoisted out of the per-step hot path on purpose."""
    # TODO(synk): on v7x the MXU is fp8-native; a per-generation fp8 path would halve
    # activation streaming bytes (not done here -- v5e/v6e MXUs are bf16/int).
    w1, b1, w2, b2, w3, b3 = params
    k, h = w1.shape
    hp = _round_up(h, lane)
    ph = hp - h
    w1t = jnp.pad(w1, ((0, 0), (0, ph))).T.astype(compute_dtype)                 # (Hp, K)
    w2t = jnp.pad(w2, ((0, ph), (0, ph))).T.astype(compute_dtype)                # (Hp, Hp)
    w3r = jnp.pad(w3.reshape(h, 1), ((0, ph), (0, 0))).T.astype(compute_dtype)   # (1, Hp)
    b1c = jnp.pad(b1.reshape(1, h), ((0, 0), (0, ph))).T.astype(jnp.float32)     # (Hp, 1)
    b2c = jnp.pad(b2.reshape(1, h), ((0, 0), (0, ph))).T.astype(jnp.float32)     # (Hp, 1)
    b3s = jnp.asarray(b3, jnp.float32).reshape(1, 1)
    return (w1t, b1c, w2t, b2c, w3r, b3s)


def critic_forward(x, a, prepared, *, tile_b=None):
    """Pallas implementation of critic.forward(x, a). `prepared` comes from prepare_params."""
    w1t, b1c, w2t, b2c, w3r, b3s = prepared
    compute_dtype = w1t.dtype
    hp, d_xa = w1t.shape
    batch = x.shape[0]

    # torch glue: .view(B, -1) then cat([x, a], 1). Cast straight to the MXU dtype and go
    # feature-major (single fused XLA copy) so batch rides the lane dimension in the kernel.
    xa = jnp.concatenate([x.reshape(batch, -1), a], axis=1)
    assert xa.shape[1] == d_xa, (xa.shape, d_xa)

    tb, b_pad = _choose_tiles(batch, tile_b)
    xa_t = xa.T.astype(compute_dtype)                          # (d_xa, B)
    if b_pad != batch:
        xa_t = jnp.pad(xa_t, ((0, 0), (0, b_pad - batch)))     # zero cols; sliced off below

    grid = (b_pad // tb,)

    def resident(arr):
        # constant block index -> weights stay VMEM-resident across grid steps (no re-DMA)
        return pl.BlockSpec(arr.shape, lambda i: (0, 0))

    out = pl.pallas_call(
        critic_kernel,
        out_shape=jax.ShapeDtypeStruct((1, b_pad), jnp.float32),
        grid=grid,
        in_specs=[
            pl.BlockSpec((d_xa, tb), lambda i: (0, i)),        # streamed activation tile
            resident(w1t), resident(b1c),
            resident(w2t), resident(b2c),
            resident(w3r), resident(b3s),
        ],
        out_specs=pl.BlockSpec((1, tb), lambda i: (0, i)),     # lane-dense output row
        compiler_params=pltpu.CompilerParams(
            dimension_semantics=("parallel",),                 # v7x: 2 TCs share the batch axis
            vmem_limit_bytes=_vmem_limit_bytes(tb, d_xa, hp, compute_dtype),
        ),
    )(xa_t, w1t, b1c, w2t, b2c, w3r, b3s)

    return out[0, :batch].reshape(batch, 1)


def init_params(key, input_shape, output_shape, hidden_size):
    """Deterministic parameter init; weights stored as (in, out), matching h @ W."""
    first = input_shape + output_shape
    k1, k2, k3, k4, k5, k6 = jax.random.split(key, 6)

    def lin(kw, kb, fan_in, fan_out):
        bound = 1.0 / jnp.sqrt(fan_in)
        w = jax.random.uniform(kw, (fan_in, fan_out), jnp.float32, -bound, bound)
        b = jax.random.uniform(kb, (1, fan_out), jnp.float32, -bound, bound)
        return w, b

    w1, b1 = lin(k1, k2, first, hidden_size)
    w2, b2 = lin(k3, k4, hidden_size, hidden_size)
    w3, b3 = lin(k5, k6, hidden_size, 1)
    return (w1, b1, w2, b2, w3, b3)


if __name__ == "__main__":
    # small, forward-consistent shapes (realistic perf needs B in the thousands; the kernel
    # pads hidden=32 -> 128 internally so real models should just pick hidden as a 128-multiple)
    batch = 8
    input_shape = 16        # flattened observation size
    output_shape = 4        # action size
    hidden_size = 32

    key = jax.random.PRNGKey(0)
    kx, ka, kp = jax.random.split(key, 3)

    # observation given as (B, 4, 4) -> flattened to 16 inside forward, action as (B, 4)
    x = jax.random.normal(kx, (batch, 4, 4), jnp.float32)
    a = jax.random.normal(ka, (batch, output_shape), jnp.float32)
    params = init_params(kp, input_shape, output_shape, hidden_size)

    prep = prepare_params(params)            # one-time repack, out of the per-step hot path
    fwd = jax.jit(critic_forward)
    out = jax.block_until_ready(fwd(x, a, prep))

    # sanity check against a plain-JAX f32 reference of the same math
    # (kernel runs fc1/fc2/fc3 on the bf16 MXU path with f32 accumulation -> loose tolerance)
    w1, b1, w2, b2, w3, b3 = params
    xa = jnp.concatenate([x.reshape(batch, -1), a], axis=1)
    ref = jnp.maximum(xa @ w1 + b1, 0.0)
    ref = jnp.maximum(ref @ w2 + b2, 0.0)
    ref = ref @ w3 + b3
    assert out.shape == (batch, 1)
    assert jnp.allclose(out, ref, atol=5e-2, rtol=5e-2), (out, ref)

    print("KERNEL_OK")
</pallas_src>

<mosaic_0001>
module attributes {stable_mosaic.version = 11 : i64} {
  func.func @critic_kernel(%arg0: i32, %arg1: memref<20x128xbf16, #tpu.memory_space<vmem>>, %arg2: memref<128x20xbf16, #tpu.memory_space<vmem>>, %arg3: memref<128x1xf32, #tpu.memory_space<vmem>>, %arg4: memref<128x128xbf16, #tpu.memory_space<vmem>>, %arg5: memref<128x1xf32, #tpu.memory_space<vmem>>, %arg6: memref<1x128xbf16, #tpu.memory_space<vmem>>, %arg7: memref<1x1xf32, #tpu.memory_space<vmem>>, %arg8: memref<1x128xf32, #tpu.memory_space<vmem>>) attributes {dimension_semantics = [#tpu.dimension_semantics<parallel>], iteration_bounds = array<i64: 1>, scalar_prefetch = 0 : i64, scratch_operands = 0 : i64, tpu.core_type = #tpu.core_type<tc>, window_params = [{transform_indices = @transform_0, window_bounds = array<i64: 20, 128>}, {pipeline_mode = #tpu.pipeline_mode<synchronous>, transform_indices = @transform_1, window_bounds = array<i64: 128, 20>}, {pipeline_mode = #tpu.pipeline_mode<synchronous>, transform_indices = @transform_2, window_bounds = array<i64: 128, 1>}, {pipeline_mode = #tpu.pipeline_mode<synchronous>, transform_indices = @transform_3, window_bounds = array<i64: 128, 128>}, {pipeline_mode = #tpu.pipeline_mode<synchronous>, transform_indices = @transform_4, window_bounds = array<i64: 128, 1>}, {pipeline_mode = #tpu.pipeline_mode<synchronous>, transform_indices = @transform_5, window_bounds = array<i64: 1, 128>}, {pipeline_mode = #tpu.pipeline_mode<synchronous>, transform_indices = @transform_6, window_bounds = array<i64: 1, 1>}, {transform_indices = @transform_7, window_bounds = array<i64: 1, 128>}]} {
    %c0 = arith.constant 0 : index
    %c0_0 = arith.constant 0 : index
    %0 = vector.load %arg2[%c0, %c0_0] : memref<128x20xbf16, #tpu.memory_space<vmem>>, vector<128x20xbf16>
    %c0_1 = arith.constant 0 : index
    %c0_2 = arith.constant 0 : index
    %1 = vector.load %arg1[%c0_1, %c0_2] : memref<20x128xbf16, #tpu.memory_space<vmem>>, vector<20x128xbf16>
    %cst = arith.constant dense<0.000000e+00> : vector<128x128xf32>
    %2 = tpu.matmul %0, %1, %cst {dimension_numbers = #tpu.dot_dimension_numbers<[1], [0], [0], [1], [0, 0, 1, 1], [], []>} : vector<128x20xbf16>, vector<20x128xbf16>, vector<128x128xf32> -> vector<128x128xf32>
    %c0_3 = arith.constant 0 : index
    %c0_4 = arith.constant 0 : index
    %3 = vector.load %arg3[%c0_3, %c0_4] : memref<128x1xf32, #tpu.memory_space<vmem>>, vector<128x1xf32>
    %4 = vector.broadcast %3 : vector<128x1xf32> to vector<128x128xf32>
    %5 = arith.addf %2, %4 : vector<128x128xf32>
    %cst_5 = arith.constant 0.000000e+00 : f32
    %6 = vector.broadcast %cst_5 : f32 to vector<128x128xf32>
    %7 = arith.maximumf %5, %6 : vector<128x128xf32>
    %c0_6 = arith.constant 0 : index
    %c0_7 = arith.constant 0 : index
    %8 = vector.load %arg4[%c0_6, %c0_7] : memref<128x128xbf16, #tpu.memory_space<vmem>>, vector<128x128xbf16>
    %9 = arith.truncf %7 : vector<128x128xf32> to vector<128x128xbf16>
    %cst_8 = arith.constant dense<0.000000e+00> : vector<128x128xf32>
    %10 = tpu.matmul %8, %9, %cst_8 {dimension_numbers = #tpu.dot_dimension_numbers<[1], [0], [0], [1], [0, 0, 1, 1], [], []>} : vector<128x128xbf16>, vector<128x128xbf16>, vector<128x128xf32> -> vector<128x128xf32>
    %c0_9 = arith.constant 0 : index
    %c0_10 = arith.constant 0 : index
    %11 = vector.load %arg5[%c0_9, %c0_10] : memref<128x1xf32, #tpu.memory_space<vmem>>, vector<128x1xf32>
    %12 = vector.broadcast %11 : vector<128x1xf32> to vector<128x128xf32>
    %13 = arith.addf %10, %12 : vector<128x128xf32>
    %cst_11 = arith.constant 0.000000e+00 : f32
    %14 = vector.broadcast %cst_11 : f32 to vector<128x128xf32>
    %15 = arith.maximumf %13, %14 : vector<128x128xf32>
    %c0_12 = arith.constant 0 : index
    %c0_13 = arith.constant 0 : index
    %16 = vector.load %arg6[%c0_12, %c0_13] : memref<1x128xbf16, #tpu.memory_space<vmem>>, vector<1x128xbf16>
    %17 = arith.truncf %15 : vector<128x128xf32> to vector<128x128xbf16>
    %cst_14 = arith.constant dense<0.000000e+00> : vector<1x128xf32>
    %18 = tpu.matmul %16, %17, %cst_14 {dimension_numbers = #tpu.dot_dimension_numbers<[1], [0], [0], [1], [0, 0, 1, 1], [], []>} : vector<1x128xbf16>, vector<128x128xbf16>, vector<1x128xf32> -> vector<1x128xf32>
    %c0_15 = arith.constant 0 : index
    %c0_16 = arith.constant 0 : index
    %19 = vector.load %arg7[%c0_15, %c0_16] : memref<1x1xf32, #tpu.memory_space<vmem>>, vector<1x1xf32>
    %20 = vector.broadcast %19 : vector<1x1xf32> to vector<1x128xf32>
    %21 = arith.addf %18, %20 : vector<1x128xf32>
    %c0_17 = arith.constant 0 : index
    %c0_18 = arith.constant 0 : index
    %22 = vector.load %arg8[%c0_17, %c0_18] : memref<1x128xf32, #tpu.memory_space<vmem>>, vector<1x128xf32>
    tpu.vector_store %arg8[%c0_17, %c0_18], %21 {strides = array<i32>} : memref<1x128xf32, #tpu.memory_space<vmem>>, vector<1x128xf32>,
    return
  }
  func.func @transform_0(%arg0: i32) -> (i32, i32) {
    %c0_i32 = arith.constant 0 : i32
    %c0_i32_0 = arith.constant 0 : i32
    return %c0_i32, %arg0 : i32, i32
  }
  func.func @transform_1(%arg0: i32) -> (i32, i32) {
    %c0_i32 = arith.constant 0 : i32
    %c0_i32_0 = arith.constant 0 : i32
    %c0_i32_1 = arith.constant 0 : i32
    return %c0_i32, %c0_i32_0 : i32, i32
  }
  func.func @transform_2(%arg0: i32) -> (i32, i32) {
    %c0_i32 = arith.constant 0 : i32
    %c0_i32_0 = arith.constant 0 : i32
    %c0_i32_1 = arith.constant 0 : i32
    return %c0_i32, %c0_i32_0 : i32, i32
  }
  func.func @transform_3(%arg0: i32) -> (i32, i32) {
    %c0_i32 = arith.constant 0 : i32
    %c0_i32_0 = arith.constant 0 : i32
    %c0_i32_1 = arith.constant 0 : i32
    return %c0_i32, %c0_i32_0 : i32, i32
  }
  func.func @transform_4(%arg0: i32) -> (i32, i32) {
    %c0_i32 = arith.constant 0 : i32
    %c0_i32_0 = arith.constant 0 : i32
    %c0_i32_1 = arith.constant 0 : i32
    return %c0_i32, %c0_i32_0 : i32, i32
  }
  func.func @transform_5(%arg0: i32) -> (i32, i32) {
    %c0_i32 = arith.constant 0 : i32
    %c0_i32_0 = arith.constant 0 : i32
    %c0_i32_1 = arith.constant 0 : i32
    return %c0_i32, %c0_i32_0 : i32, i32
  }
  func.func @transform_6(%arg0: i32) -> (i32, i32) {
    %c0_i32 = arith.constant 0 : i32
    %c0_i32_0 = arith.constant 0 : i32
    %c0_i32_1 = arith.constant 0 : i32
    return %c0_i32, %c0_i32_0 : i32, i32
  }
  func.func @transform_7(%arg0: i32) -> (i32, i32) {
    %c0_i32 = arith.constant 0 : i32
    %c0_i32_0 = arith.constant 0 : i32
    return %c0_i32, %arg0 : i32, i32
  }
}

</mosaic_0001>

<bundles_post_ra>
// kernel: critic_forward.1
= control target key start
LH: loop header
LB: loop body
LE: loop exit
PB: predicated region body
PF: predicated region fallthrough
CT: control target
= control target key end

     0   :  { %v661_v0 = vmov 0   ;;  %vm218_vm0 = vcmask 1041408   ;;  %vm193_vm1 = vcmask 162816   ;;  %s882_s2 = inlined_call_operand.vmem [shape: f32[128,1], index: 2, kind: input, shape index: {}]   ;;  %s883_s0 = inlined_call_operand.vmem [shape: bf16[20,128], index: 0, kind: input, shape index: {}]   ;;  %s884_s1 = inlined_call_operand.vmem [shape: bf16[128,20], index: 1, kind: input, shape index: {}]   ;;  %s885_s4 = inlined_call_operand.vmem [shape: f32[128,1], index: 4, kind: input, shape index: {}]   ;;  %s886_s6 = inlined_call_operand.<no memory space> [shape: f32[1,1], index: 6, kind: input, shape index: {}]   ;;  %s887_s3 = inlined_call_operand.vmem [shape: bf16[128,128], index: 3, kind: input, shape index: {}]   ;;  %s888_s5 = inlined_call_operand.vmem [shape: bf16[1,128], index: 5, kind: input, shape index: {}]   ;;  %s889_s7 = inlined_call_operand.vmem [shape: f32[1,128], index: 7, kind: output, shape index: {}]  }
   0x1   :  { %659 = vset.pattern.permute.xlu1 %v661_v0  ;;  %658 = vset.pattern.permute.xlu0 %v661_v0  ;;  %v62_v1 = vld [vmem:[%s882_s2 + $0x70] sm:$0xff]  ;;  %v60_v2 = vld [vmem:[%s882_s2 + $0x60] sm:$0xff]  ;;  %v47_v3 = vld [vmem:[%s883_s0 + $0x8] sm:$0x3]  ;;  %v12_v33 = vstv %s886_s6 }
   0x2   :  { %136 = vperm.xlu0 %658, %v62_v1   ;;  %126 = vperm.xlu1 %659, %v60_v2   ;;  %v189_v4 = vunpack.c.l.b16 %v47_v3  ;;  %v58_v5 = vld [vmem:[%s882_s2 + $0x50] sm:$0xff]  ;;  %v63_v8 = vld [vmem:[%s882_s2 + $0x78] sm:$0xff]  ;;  %v61_v9 = vld [vmem:[%s882_s2 + $0x68] sm:$0xff]  ;;  %13 = vst [vmem:[#allocation2] sm:$0x1] %v12_v33 }
   0x3   :  { %660 = vset.pattern.permute.xlu2 %v661_v0  ;;  %v638_v10 = vld [vmem:[%s883_s0] sm:$0xff]  ;;  %v59_v11 = vld [vmem:[%s882_s2 + $0x58] sm:$0xff]  ;;  %v635_v13 = vld [vmem:[%s884_s1 + $0x28] sm:$0xff] }
   0x4   :  { %v191_v6 = vpack.c.b16 %v189_v4, %v189_v4  ;;  %116 = vperm.xlu2 %660, %v58_v5   ;;  %v630_v12 = vld [vmem:[%s884_s1] sm:$0xff]  ;;  %v57_v14 = vld [vmem:[%s882_s2 + $0x48] sm:$0xff]  ;;  %v54_v16 = vld [vmem:[%s882_s2 + $0x30] sm:$0xff] }
   0x5   :  { %v56_v15 = vld [vmem:[%s882_s2 + $0x40] sm:$0xff]  ;;  %v55_v17 = vld [vmem:[%s882_s2 + $0x38] sm:$0xff]  ;;  %v53_v19 = vld [vmem:[%s882_s2 + $0x28] sm:$0xff] }
   0x6   :  { %v220_v7 = vsel %vm218_vm0, %v191_v6, 0  ;;  %v52_v18 = vld [vmem:[%s882_s2 + $0x20] sm:$0xff]  ;;  %v631_v20 = vld [vmem:[%s884_s1 + $0x8] sm:$0xff]  ;;  %v636_v21 = vld [vmem:[%s884_s1 + $0x30] sm:$0xff] }
   0x7   :  { %228 = vmatpush.bf16.msra.mxu0 %v220_v7  ;;  %647 = vmatpush.bf16.msra.mxu2 %v220_v7  ;;  %v51_v22 = vld [vmem:[%s882_s2 + $0x18] sm:$0xff]  ;;  %v50_v23 = vld [vmem:[%s882_s2 + $0x10] sm:$0xff]  ;;  %v48_v24 = vld [vmem:[%s882_s2] sm:$0xff] }
   0x8   :  { %v325_v25 = vld [vmem:[%s885_s4 + $0x70] sm:$0xff]  ;;  %v49_v26 = vld [vmem:[%s882_s2 + $0x8] sm:$0xff]  ;;  %v326_v27 = vld [vmem:[%s885_s4 + $0x78] sm:$0xff] }
   0x9   :  { %v632_v28 = vld [vmem:[%s884_s1 + $0x10] sm:$0xff]  ;;  %v637_v29 = vld [vmem:[%s884_s1 + $0x38] sm:$0xff]  ;;  %v324_v30 = vld [vmem:[%s885_s4 + $0x68] sm:$0xff] }
   0xa   :  { %141 = vperm.xlu0 %658, %v63_v8   ;;  %131 = vperm.xlu1 %659, %v61_v9   ;;  %v323_v31 = vld [vmem:[%s885_s4 + $0x60] sm:$0xff]  ;;  %v321_v32 = vld [vmem:[%s885_s4 + $0x50] sm:$0xff]  ;;  %v322_v35 = vld [vmem:[%s885_s4 + $0x58] sm:$0xff] }
   0xb   :  { %229 = vmatpush.bf16.msra.mxu0 %v638_v10  ;;  %648 = vmatpush.bf16.msra.mxu2 %v638_v10  ;;  %v319_v34 = vld [vmem:[%s885_s4 + $0x40] sm:$0xff]  ;;  %v320_v36 = vld [vmem:[%s885_s4 + $0x48] sm:$0xff]  ;;  %v633_v37 = vld [vmem:[%s884_s1 + $0x18] sm:$0xff] }
   0xc   :  { %121 = vperm.xlu2 %660, %v59_v11   ;;  %v318_v38 = vld [vmem:[%s885_s4 + $0x38] sm:$0xff]  ;;  %v317_v39 = vld [vmem:[%s885_s4 + $0x30] sm:$0xff]  ;;  %v315_v40 = vld [vmem:[%s885_s4 + $0x20] sm:$0xff] }
   0xd   :  { %v313_v41 = vld [vmem:[%s885_s4 + $0x10] sm:$0xff]  ;;  %v316_v42 = vld [vmem:[%s885_s4 + $0x28] sm:$0xff]  ;;  %v314_v43 = vld [vmem:[%s885_s4 + $0x18] sm:$0xff] }
   0xe   :  { %590 = vmatmul.msk.bf16.vlgmr.msra.gmra.mxu0 %vm193_vm1, %v630_v12  ;;  %595 = vmatmul.msk.bf16.vlgmr.msra.gmra.mxu2 %vm193_vm1, %v635_v13  ;;  %v634_v44 = vld [vmem:[%s884_s1 + $0x20] sm:$0xff]  ;;  %v312_v45 = vld [vmem:[%s885_s4 + $0x8] sm:$0xff] }
   0xf   :  { %v311_v46 = vld [vmem:[%s885_s4] sm:$0xff] }
  0x10   :  { %v529_v47 = vld [vmem:[#allocation2] sm:$0x1] }
  0x12   :  { %111 = vperm.xlu1 %659, %v57_v14   ;;  %106 = vperm.xlu0 %658, %v56_v15  }
  0x14   :  { %96 = vperm.xlu2 %660, %v54_v16  }
  0x1a   :  { %101 = vperm.xlu0 %658, %v55_v17   ;;  %86 = vperm.xlu1 %659, %v52_v18  }
  0x1c   :  { %91 = vperm.xlu2 %660, %v53_v19  }
  0x1e   :  { %591 = vmatmul.msk.bf16.gmra.mxu0 %vm193_vm1, %v631_v20  ;;  %596 = vmatmul.msk.bf16.gmra.mxu2 %vm193_vm1, %v636_v21 }
  0x22   :  { %81 = vperm.xlu1 %659, %v51_v22   ;;  %76 = vperm.xlu0 %658, %v50_v23  }
  0x24   :  { %66 = vperm.xlu2 %660, %v48_v24  }
  0x2a   :  { %399 = vperm.xlu1 %659, %v325_v25   ;;  %71 = vperm.xlu0 %658, %v49_v26  }
  0x2c   :  { %404 = vperm.xlu2 %660, %v326_v27  }
  0x2e   :  { %592 = vmatmul.msk.bf16.gmra.mxu0 %vm193_vm1, %v632_v28  ;;  %597 = vmatmul.msk.bf16.gmra.mxu2 %vm193_vm1, %v637_v29 }
  0x32   :  { %394 = vperm.xlu1 %659, %v324_v30   ;;  %389 = vperm.xlu0 %658, %v323_v31  }
  0x34   :  { %379 = vperm.xlu2 %660, %v321_v32  }
  0x3a   :  { %369 = vperm.xlu1 %659, %v319_v34   ;;  %384 = vperm.xlu0 %658, %v322_v35  }
  0x3c   :  { %374 = vperm.xlu2 %660, %v320_v36  }
  0x3e   :  { %593 = vmatmul.msk.bf16.gmra.mxu0 %vm193_vm1, %v633_v37 }
  0x42   :  { %364 = vperm.xlu1 %659, %v318_v38   ;;  %359 = vperm.xlu0 %658, %v317_v39  }
  0x44   :  { %349 = vperm.xlu2 %660, %v315_v40  }
  0x4a   :  { %339 = vperm.xlu1 %659, %v313_v41   ;;  %354 = vperm.xlu0 %658, %v316_v42  }
  0x4c   :  { %344 = vperm.xlu2 %660, %v314_v43  }
  0x4e   :  { %594 = vmatmul.msk.bf16.gmra.mxu0 %vm193_vm1, %v634_v44 }
  0x52   :  { %334 = vperm.xlu1 %659, %v312_v45   ;;  %329 = vperm.xlu0 %658, %v311_v46  }
  0x54   :  { %532 = vperm.xlu2 %660, %v529_v47  }
  0x5e   :  { %v117_v48 = vpop.permute.xlu2 %116 }
  0x66   :  { %v122_v50 = vpop.permute.xlu2 %121 }
  0x6e   :  { %v97_v52 = vpop.permute.xlu2 %96 }
  0x74   :  { %v137_v49 = vpop.permute.xlu0 %136  ;;  %v127_v9 = vpop.permute.xlu1 %126 }
  0x76   :  { %v92_v56 = vpop.permute.xlu2 %91 }
  0x7c   :  { %v142_v51 = vpop.permute.xlu0 %141  ;;  %v132_v13 = vpop.permute.xlu1 %131 }
  0x7e   :  { %v67_v60 = vpop.permute.xlu2 %66 }
  0x84   :  { %v107_v53 = vpop.permute.xlu0 %106  ;;  %v112_v31 = vpop.permute.xlu1 %111 }
  0x8b   :  { %v231_v54 = vpop.f32.mrf.mxu0 }
  0x8c   :  { %v102_v55 = vpop.permute.xlu0 %101  ;;  %v232_v62 = vadd.f32 %v231_v54, %v67_v60  ;;  %v87_v33 = vpop.permute.xlu1 %86  ;;  %v641_v60 = vld [vmem:[%s887_s3 + $0x10] sm:$0xff] }
  0x8e   :  { %v271_v2 = vmax.f32 %v232_v62, 0.0  ;;  %v642_v62 = vld [vmem:[%s887_s3 + $0x18] sm:$0xff] }
  0x91   :  { %v256_v57 = vpop.f32.mrf.mxu2 }
  0x92   :  { %v257_v21 = vadd.f32 %v256_v57, %v117_v48  ;;  %v643_v57 = vld [vmem:[%s887_s3 + $0x20] sm:$0xff] }
  0x93   :  { %v233_v58 = vpop.f32.mrf.mxu0 }
  0x94   :  { %v839_v59 = vpop.permute.xlu0 %76  ;;  %v281_v26 = vmax.f32 %v257_v21, 0.0  ;;  %v82_v46 = vpop.permute.xlu1 %81 }
  0x99   :  { %v258_v61 = vpop.f32.mrf.mxu2 }
  0x9a   :  { %v259_v22 = vadd.f32 %v258_v61, %v122_v50  ;;  %v645_v61 = vld [vmem:[%s887_s3 + $0x30] sm:$0xff] }
  0x9b   :  { %v236_v63 = vpop.f32.mrf.mxu0 }
  0x9c   :  { %v72_v0 = vpop.permute.xlu0 %71  ;;  %v282_v27 = vmax.f32 %v259_v22, 0.0  ;;  %v237_v50 = vadd.f32 %v236_v63, %v839_v59  ;;  %v644_v59 = vld [vmem:[%s887_s3 + $0x28] sm:$0xff]  ;;  %v646_v63 = vld [vmem:[%s887_s3 + $0x38] sm:$0xff] }
  0x9d   :  { %v234_v1 = vadd.f32 %v233_v58, %v72_v0  ;;  %v640_v58 = vld [vmem:[%s887_s3 + $0x8] sm:$0xff] }
  0x9e   :  { %v308_v30 = vpack.c.bf16 %v282_v27, %v281_v26  ;;  %v273_v54 = vmax.f32 %v237_v50, 0.0 }
  0x9f   :  { %v272_v3 = vmax.f32 %v234_v1, 0.0 }
  0xa1   :  { %v261_v4 = vpop.f32.mrf.mxu2  ;;  %v841_v5 = vpack.c.bf16 %v272_v3, %v271_v2 }
  0xa2   :  { %v262_v15 = vadd.f32 %v261_v4, %v127_v9 }
  0xa3   :  { %v238_v6 = vpop.f32.mrf.mxu0 }
  0xa4   :  { %v283_v23 = vmax.f32 %v262_v15, 0.0  ;;  %v239_v47 = vadd.f32 %v238_v6, %v82_v46 }
  0xa9   :  { %v263_v7 = vpop.f32.mrf.mxu2 }
  0xaa   :  { %v264_v16 = vadd.f32 %v263_v7, %v132_v13 }
  0xab   :  { %v241_v8 = vpop.f32.mrf.mxu0 }
  0xac   :  { %v284_v24 = vmax.f32 %v264_v16, 0.0  ;;  %v242_v44 = vadd.f32 %v241_v8, %v87_v33  ;;  %v400_v8 = vpop.permute.xlu1 %399 }
  0xae   :  { %v309_v28 = vpack.c.bf16 %v284_v24, %v283_v23 }
  0xb1   :  { %v266_v10 = vpop.f32.mrf.mxu2 }
  0xb2   :  { %v267_v12 = vadd.f32 %v266_v10, %v137_v49  ;;  %v405_v10 = vpop.permute.xlu2 %404 }
  0xb3   :  { %v243_v11 = vpop.f32.mrf.mxu0 }
  0xb4   :  { %v285_v17 = vmax.f32 %v267_v12, 0.0  ;;  %v244_v41 = vadd.f32 %v243_v11, %v92_v56  ;;  %v639_v56 = vld [vmem:[%s887_s3] sm:$0xff]  ;;  %v395_v12 = vpop.permute.xlu1 %394 }
  0xb6   :  { %v276_v48 = vmax.f32 %v244_v41, 0.0 }
  0xb9   :  { %v268_v14 = vpop.f32.mrf.mxu2 }
  0xba   :  { %v269_v18 = vadd.f32 %v268_v14, %v142_v51  ;;  %v275_v51 = vmax.f32 %v242_v44, 0.0  ;;  %v390_v14 = vpop.permute.xlu0 %389  ;;  %v380_v15 = vpop.permute.xlu2 %379 }
  0xbb   :  { %v246_v19 = vpop.f32.mrf.mxu0 }
  0xbc   :  { %v286_v20 = vmax.f32 %v269_v18, 0.0  ;;  %v247_v38 = vadd.f32 %v246_v19, %v97_v52  ;;  %v305_v52 = vpack.c.bf16 %v276_v48, %v275_v51  ;;  %v370_v18 = vpop.permute.xlu1 %369 }
  0xbe   :  { %v310_v25 = vpack.c.bf16 %v286_v20, %v285_v17  ;;  %v277_v45 = vmax.f32 %v247_v38, 0.0 }
  0xc0   :  { %455 = vmatpush.bf16.msra.mxu1 %v310_v25  ;;  %649 = vmatpush.bf16.msra.mxu3 %v310_v25 }
  0xc2   :  { %v385_v19 = vpop.permute.xlu0 %384  ;;  %v375_v20 = vpop.permute.xlu2 %374 }
  0xc3   :  { %v248_v29 = vpop.f32.mrf.mxu0 }
  0xc4   :  { %456 = vmatpush.bf16.msra.mxu1 %v309_v28  ;;  %650 = vmatpush.bf16.msra.mxu3 %v309_v28  ;;  %v249_v36 = vadd.f32 %v248_v29, %v102_v55  ;;  %v365_v29 = vpop.permute.xlu1 %364 }
  0xc6   :  { %v278_v42 = vmax.f32 %v249_v36, 0.0 }
  0xc8   :  { %457 = vmatpush.bf16.msra.mxu1 %v308_v30  ;;  %651 = vmatpush.bf16.msra.mxu3 %v308_v30  ;;  %v306_v49 = vpack.c.bf16 %v278_v42, %v277_v45 }
  0xca   :  { %v360_v33 = vpop.permute.xlu0 %359 }
  0xcb   :  { %v251_v32 = vpop.f32.mrf.mxu0 }
  0xcc   :  { %v252_v34 = vadd.f32 %v251_v32, %v107_v53  ;;  %v274_v53 = vmax.f32 %v239_v47, 0.0  ;;  %v340_v46 = vpop.permute.xlu1 %339 }
  0xce   :  { %v279_v39 = vmax.f32 %v252_v34, 0.0  ;;  %v304_v55 = vpack.c.bf16 %v274_v53, %v273_v54 }
  0xd3   :  { %v253_v35 = vpop.f32.mrf.mxu0 }
  0xd4   :  { %v254_v37 = vadd.f32 %v253_v35, %v112_v31 }
  0xd6   :  { %v280_v40 = vmax.f32 %v254_v37, 0.0 }
  0xd8   :  { %v307_v43 = vpack.c.bf16 %v280_v40, %v279_v39  ;;  %v350_v39 = vpop.permute.xlu2 %349 }
  0xda   :  { %458 = vmatpush.bf16.msra.mxu1 %v307_v43  ;;  %652 = vmatpush.bf16.msra.mxu3 %v307_v43 }
  0xde   :  { %459 = vmatpush.bf16.msra.mxu1 %v306_v49  ;;  %653 = vmatpush.bf16.msra.mxu3 %v306_v49  ;;  %v355_v49 = vpop.permute.xlu0 %354 }
  0xe2   :  { %460 = vmatpush.bf16.msra.mxu1 %v305_v52  ;;  %654 = vmatpush.bf16.msra.mxu3 %v305_v52 }
  0xe6   :  { %461 = vmatpush.bf16.msra.mxu1 %v304_v55  ;;  %655 = vmatpush.bf16.msra.mxu3 %v304_v55  ;;  %v345_v55 = vpop.permute.xlu2 %344 }
  0xea   :  { %462 = vmatpush.bf16.msra.mxu1 %v841_v5  ;;  %656 = vmatpush.bf16.msra.mxu3 %v841_v5 }
  0xed   :  { %463 = vmatmul.bf16.vlgmr.msra.gmra.mxu1 %v639_v56  ;;  %483 = vmatmul.bf16.vlgmr.msra.gmra.mxu3 %v643_v57 }
  0xfd   :  { %468 = vmatmul.bf16.gmra.mxu1 %v640_v58  ;;  %488 = vmatmul.bf16.gmra.mxu3 %v644_v59 }
 0x10d   :  { %473 = vmatmul.bf16.gmra.mxu1 %v641_v60  ;;  %493 = vmatmul.bf16.gmra.mxu3 %v645_v61  ;;  %v335_v61 = vpop.permute.xlu1 %334 }
 0x11d   :  { %478 = vmatmul.bf16.gmra.mxu1 %v642_v62  ;;  %498 = vmatmul.bf16.gmra.mxu3 %v646_v63 }
 0x16a   :  { %v870_v0 = vpop.f32.mrf.mxu1 }
 0x170   :  { %v484_v1 = vpop.f32.mrf.mxu3 }
 0x171   :  { %v485_v41 = vadd.f32 %v484_v1, %v370_v18 }
 0x172   :  { %v872_v2 = vpop.f32.mrf.mxu1 }
 0x173   :  { %v512_v47 = vmax.f32 %v485_v41, 0.0  ;;  %v467_v62 = vadd.f32 %v872_v2, %v335_v61 }
 0x178   :  { %v486_v3 = vpop.f32.mrf.mxu3 }
 0x179   :  { %v487_v36 = vadd.f32 %v486_v3, %v375_v20  ;;  %v330_v3 = vpop.permute.xlu0 %329 }
 0x17a   :  { %v469_v4 = vpop.f32.mrf.mxu1 }
 0x17b   :  { %v513_v43 = vmax.f32 %v487_v36, 0.0  ;;  %v470_v59 = vadd.f32 %v469_v4, %v340_v46  ;;  %v520_v4 = vld [vmem:[%s888_s5] sm:$0x1] }
 0x17d   :  { %v525_v53 = vpack.c.bf16 %v513_v43, %v512_v47 }
 0x180   :  { %v489_v5 = vpop.f32.mrf.mxu3 }
 0x181   :  { %v490_v34 = vadd.f32 %v489_v5, %v380_v15  ;;  %v465_v5 = vadd.f32 %v870_v0, %v330_v3 }
 0x182   :  { %v471_v7 = vpop.f32.mrf.mxu1 }
 0x183   :  { %v514_v42 = vmax.f32 %v490_v34, 0.0  ;;  %v472_v56 = vadd.f32 %v471_v7, %v345_v55 }
 0x185   :  { %v507_v63 = vmax.f32 %v472_v56, 0.0 }
 0x188   :  { %v491_v6 = vpop.f32.mrf.mxu3 }
 0x189   :  { %v492_v30 = vadd.f32 %v491_v6, %v385_v19  ;;  %v506_v6 = vmax.f32 %v470_v59, 0.0 }
 0x18a   :  { %v474_v11 = vpop.f32.mrf.mxu1 }
 0x18b   :  { %v515_v37 = vmax.f32 %v492_v30, 0.0  ;;  %v475_v52 = vadd.f32 %v474_v11, %v350_v39  ;;  %v533_v11 = vpop.permute.xlu2 %532 }
 0x18c   :  { %v535_v2 = vperm.slane %v533_v11, 0 }
 0x18d   :  { %v526_v45 = vpack.c.bf16 %v515_v37, %v514_v42  ;;  %v508_v60 = vmax.f32 %v475_v52, 0.0 }
 0x190   :  { %v494_v9 = vpop.f32.mrf.mxu3 }
 0x191   :  { %v495_v26 = vadd.f32 %v494_v9, %v390_v14  ;;  %v522_v9 = vpack.c.bf16 %v507_v63, %v506_v6 }
 0x192   :  { %v476_v16 = vpop.f32.mrf.mxu1 }
 0x193   :  { %v516_v35 = vmax.f32 %v495_v26, 0.0  ;;  %v477_v50 = vadd.f32 %v476_v16, %v355_v49 }
 0x195   :  { %v509_v57 = vmax.f32 %v477_v50, 0.0 }
 0x197   :  { %v523_v1 = vpack.c.bf16 %v509_v57, %v508_v60 }
 0x198   :  { %v496_v13 = vpop.f32.mrf.mxu3 }
 0x199   :  { %v497_v24 = vadd.f32 %v496_v13, %v395_v12 }
 0x19a   :  { %v479_v22 = vpop.f32.mrf.mxu1 }
 0x19b   :  { %v517_v31 = vmax.f32 %v497_v24, 0.0  ;;  %v480_v48 = vadd.f32 %v479_v22, %v360_v33 }
 0x19d   :  { %v527_v38 = vpack.c.bf16 %v517_v31, %v516_v35  ;;  %v510_v54 = vmax.f32 %v480_v48, 0.0 }
 0x1a0   :  { %v499_v17 = vpop.f32.mrf.mxu3 }
 0x1a1   :  { %v500_v21 = vadd.f32 %v499_v17, %v400_v8  ;;  %v505_v8 = vmax.f32 %v467_v62, 0.0 }
 0x1a2   :  { %v481_v40 = vpop.f32.mrf.mxu1 }
 0x1a3   :  { %v518_v27 = vmax.f32 %v500_v21, 0.0  ;;  %v482_v44 = vadd.f32 %v481_v40, %v365_v29 }
 0x1a5   :  { %v511_v51 = vmax.f32 %v482_v44, 0.0 }
 0x1a7   :  { %v524_v58 = vpack.c.bf16 %v511_v51, %v510_v54 }
 0x1a8   :  { %v501_v23 = vpop.f32.mrf.mxu3 }
 0x1a9   :  { %v502_v25 = vadd.f32 %v501_v23, %v405_v10  ;;  %v504_v10 = vmax.f32 %v465_v5, 0.0 }
 0x1ab   :  { %v519_v28 = vmax.f32 %v502_v25, 0.0  ;;  %v521_v7 = vpack.c.bf16 %v505_v8, %v504_v10 }
 0x1ad   :  { %v528_v32 = vpack.c.bf16 %v519_v28, %v518_v27 }
 0x1af   :  { %536 = vmatpush.bf16.msrb.mxu2 %v528_v32 }
 0x1b3   :  { %537 = vmatpush.bf16.msrb.mxu2 %v527_v38 }
 0x1b7   :  { %538 = vmatpush.bf16.msrb.mxu2 %v526_v45 }
 0x1bb   :  { %539 = vmatpush.bf16.msrb.mxu2 %v525_v53 }
 0x1bf   :  { %540 = vmatpush.bf16.msrb.mxu2 %v524_v58 }
 0x1c3   :  { %541 = vmatpush.bf16.msrb.mxu2 %v523_v1 }
 0x1c7   :  { %542 = vmatpush.bf16.msrb.mxu2 %v522_v9 }
 0x1cb   :  { %543 = vmatpush.bf16.msrb.mxu2 %v521_v7 }
 0x1ce   :  { %544 = vmatmul.bf16.vlgmr.msrb.gmra.mxu2 %v520_v4 }
 0x251   :  { %v545_v12 = vpop.f32.mrf.mxu2 }
 0x252   :  { %v546_v13 = vadd.f32 %v545_v12, %v535_v2 }
 0x254   :  { %549 = vst [vmem:[%s889_s7] sm:$0x1] %v546_v13 }
 0x259   :  { %v547_v0 = vpop.f32.mrf.mxu2 }

</bundles_post_ra>
